<compile_context>
chip_gen: v7x
topology: tpu7x:2x2x1
jax: 0.10.0
libtpu: 0.0.40
codegen_flags: <defaults>
</compile_context>

<pallas_src>
import jax
import jax.numpy as jnp
from jax.experimental import pallas as pl
from jax.experimental.pallas import tpu as pltpu

HIDDEN = 32      # hidden_size
VOCAB = 16       # input_size (embedding vocabulary)
OUTPUT = 16      # output_size
N_LAYERS = 1

LANES = 128
BIAS_LANE = 3 * HIDDEN           # lane / weight-row 96: folded-bias lane
GATE_COLS = 4 * LANES            # [r | z | i_n | h_n] gate blocks, 128 lanes each
W_COLS = 5 * LANES               # + decoder block


def gru_kernel(tok_ref, emb_ref, w_ref, h0_ref, out_ref, hfin_ref, hscr):
    """One recurrent GRU step per grid iteration (grid=(T,), "arbitrary").

    tok_ref : SMEM (T, 2) int32 token ids (scalar-prefetched).
    emb_ref : VMEM (2*VOCAB, 1, 128) f32 packed embedding table:
                rows 0:V  -> emb[v] at lanes 32:64, plus 1.0 at lane 96 (bias)
                rows V:2V -> emb[v] at lanes 64:96
    w_ref   : VMEM (128, 640) bf16 packed weights. Rows == xh lanes:
                rows 0:32 = W_h* / W_dec, rows 32:96 = W_i*, row 96 = biases.
              Cols: [r | z | i_n | h_n | dec], 128-lane blocks, real outputs at
              lanes 0:32 (0:16 for the decoder) of each block.
    h0_ref  : VMEM (1, 1, 32) f32 initial hidden state.
    out_ref : VMEM (1, 1, 16) f32 logits for this step.
    hfin_ref: VMEM (1, 1, 32) f32 final hidden (same block every step).
    hscr    : VMEM (1, 128) f32 recurrent hidden in packed layout (lanes 0:32,
              exact zeros elsewhere — load-bearing for the bias-lane trick).
    """
    t = pl.program_id(0)

    @pl.when(t == 0)
    def _init():
        hscr[...] = jnp.zeros_like(hscr)
        hscr[:, 0:HIDDEN] = h0_ref[0]

    # Fused [h | x0 | x1 | 1] row: three lane-aligned adds, no XLU shifts.
    tok0 = tok_ref[t, 0]
    tok1 = tok_ref[t, 1]
    e0 = emb_ref[tok0]                      # (1, 128): lanes 32:64, 1.0 @ lane 96
    e1 = emb_ref[VOCAB + tok1]              # (1, 128): lanes 64:96
    h_prev = hscr[...]                      # (1, 128): lanes 0:32
    xh = (h_prev + e0 + e1).astype(jnp.bfloat16)

    # ONE MXU matmul -> all four gate pre-activations (biases folded via row 96).
    gates = jnp.dot(xh, w_ref[:, 0:GATE_COLS],
                    preferred_element_type=jnp.float32)          # (1, 512) f32
    r = jax.nn.sigmoid(gates[:, 0 * LANES:1 * LANES])
    z = jax.nn.sigmoid(gates[:, 1 * LANES:2 * LANES])
    n = jnp.tanh(gates[:, 2 * LANES:3 * LANES] + r * gates[:, 3 * LANES:4 * LANES])
    h_new = (1.0 - z) * n + z * h_prev      # real values in lanes 0:32, 0 elsewhere
    hscr[...] = h_new                       # stays packed for the next step

    # Decoder: inject constant 1 at the bias lane, one more MXU matmul.
    lane = jax.lax.broadcasted_iota(jnp.int32, (1, LANES), 1)
    dec_in = (h_new + (lane == BIAS_LANE).astype(jnp.float32)).astype(jnp.bfloat16)
    logits = jnp.dot(dec_in, w_ref[:, GATE_COLS:W_COLS],
                     preferred_element_type=jnp.float32)         # (1, 128) f32

    out_ref[0] = logits[:, 0:OUTPUT]
    hfin_ref[0] = h_new[:, 0:HIDDEN]


def init_params(key):
    """Synthetic parameters. emb ~ N(0,1) (nn.Embedding default); GRU / Linear
    params ~ U(-1/sqrt(H), 1/sqrt(H)). Weights stored (in_features, out_features)."""
    ks = jax.random.split(key, 7)
    s = 1.0 / float(jnp.sqrt(jnp.float32(HIDDEN)))
    return {
        "emb":   jax.random.normal(ks[0], (VOCAB, HIDDEN), jnp.float32),
        "w_ih":  jax.random.uniform(ks[1], (2 * HIDDEN, 3 * HIDDEN), jnp.float32, -s, s),
        "w_hh":  jax.random.uniform(ks[2], (HIDDEN, 3 * HIDDEN), jnp.float32, -s, s),
        "b_ih":  jax.random.uniform(ks[3], (1, 3 * HIDDEN), jnp.float32, -s, s),
        "b_hh":  jax.random.uniform(ks[4], (1, 3 * HIDDEN), jnp.float32, -s, s),
        "w_dec": jax.random.uniform(ks[5], (HIDDEN, OUTPUT), jnp.float32, -s, s),
        "b_dec": jax.random.uniform(ks[6], (1, OUTPUT), jnp.float32, -s, s),
    }


def pack_weights(p):
    """Pack GRU + decoder weights/biases into one lane-dense (128, 640) bf16 slab.
    Rows: 0:32 hidden path (W_h*/W_dec), 32:96 input path (W_i*), 96 biases."""
    H = HIDDEN
    w_ih, w_hh = p["w_ih"], p["w_hh"]        # (2H,3H), (H,3H); gate cols [r|z|n]
    b_ih, b_hh = p["b_ih"][0], p["b_hh"][0]
    slab = jnp.zeros((LANES, W_COLS), jnp.float32)

    def gate(slab, blk, hh_cols, ih_cols, bias):
        c = blk * LANES
        if hh_cols is not None:
            slab = slab.at[0:H, c:c + H].set(hh_cols)
        if ih_cols is not None:
            slab = slab.at[H:3 * H, c:c + H].set(ih_cols)
        return slab.at[BIAS_LANE, c:c + H].set(bias)

    slab = gate(slab, 0, w_hh[:, 0:H], w_ih[:, 0:H], b_ih[0:H] + b_hh[0:H])            # r
    slab = gate(slab, 1, w_hh[:, H:2 * H], w_ih[:, H:2 * H],
                b_ih[H:2 * H] + b_hh[H:2 * H])                                         # z
    slab = gate(slab, 2, None, w_ih[:, 2 * H:3 * H], b_ih[2 * H:3 * H])                # i_n
    slab = gate(slab, 3, w_hh[:, 2 * H:3 * H], None, b_hh[2 * H:3 * H])                # h_n
    # Decoder block (cols 512:640).
    slab = slab.at[0:H, 4 * LANES:4 * LANES + OUTPUT].set(p["w_dec"])
    slab = slab.at[BIAS_LANE, 4 * LANES:4 * LANES + OUTPUT].set(p["b_dec"][0])
    return slab.astype(jnp.bfloat16)


def pack_embedding(emb):
    """Two-slot embedding table so the in-kernel gather is a plain row read:
    slot 0 (rows 0:V) already sits at lanes 32:64 with the constant-1 bias lane
    folded in; slot 1 (rows V:2V) sits at lanes 64:96."""
    H = HIDDEN
    slab = jnp.zeros((2 * VOCAB, 1, LANES), jnp.float32)
    slab = slab.at[0:VOCAB, 0, H:2 * H].set(emb)
    slab = slab.at[0:VOCAB, 0, BIAS_LANE].set(1.0)
    slab = slab.at[VOCAB:2 * VOCAB, 0, 2 * H:3 * H].set(emb)
    return slab


@jax.jit
def gru_forward(w_slab, emb_slab, tokens, hidden):
    """Runs T recurrent GRU steps in ONE pallas_call (T = tokens.shape[0]).
    T = 1 reproduces GRUmodel.forward(input, hidden) exactly.

    tokens: int32 (T, 2) token-id pairs (== input.view(1, -1) per step)
    hidden: f32 (N_LAYERS, 1, HIDDEN)
    returns (logits (T, OUTPUT), final hidden (N_LAYERS, 1, HIDDEN))
    """
    T = tokens.shape[0]
    grid_spec = pltpu.PrefetchScalarGridSpec(
        num_scalar_prefetch=1,                 # tokens -> SMEM
        grid=(T,),
        in_specs=[
            # Constant index maps: both tables DMAed once, VMEM-resident for all T.
            pl.BlockSpec((2 * VOCAB, 1, LANES), lambda t, tok: (0, 0, 0)),
            pl.BlockSpec((LANES, W_COLS), lambda t, tok: (0, 0)),
            pl.BlockSpec((N_LAYERS, 1, HIDDEN), lambda t, tok: (0, 0, 0)),
        ],
        out_specs=[
            pl.BlockSpec((1, 1, OUTPUT), lambda t, tok: (t, 0, 0)),          # per-step logits
            pl.BlockSpec((N_LAYERS, 1, HIDDEN), lambda t, tok: (0, 0, 0)),   # final hidden
        ],
        scratch_shapes=[pltpu.VMEM((1, LANES), jnp.float32)],                # packed recurrent h
    )
    logits, h_out = pl.pallas_call(
        gru_kernel,
        out_shape=(jax.ShapeDtypeStruct((T, 1, OUTPUT), jnp.float32),
                   jax.ShapeDtypeStruct((N_LAYERS, 1, HIDDEN), jnp.float32)),
        grid_spec=grid_spec,
        compiler_params=pltpu.CompilerParams(
            dimension_semantics=("arbitrary",)),     # recurrent over T
    )(tokens, emb_slab, w_slab, hidden)
    return logits.reshape(T, OUTPUT), h_out


def gru_reference(p, tokens, hidden):
    """Pure-JAX f32 reference matching PyTorch nn.GRU + nn.Linear semantics."""
    H = HIDDEN
    hp = jax.lax.Precision.HIGHEST
    x = p["emb"][jnp.asarray(tokens).reshape(-1)].reshape(1, 2 * H)
    h = hidden.reshape(1, H)
    gi = jnp.dot(x, p["w_ih"], precision=hp) + p["b_ih"]
    gh = jnp.dot(h, p["w_hh"], precision=hp) + p["b_hh"]
    r = jax.nn.sigmoid(gi[:, 0:H] + gh[:, 0:H])
    z = jax.nn.sigmoid(gi[:, H:2 * H] + gh[:, H:2 * H])
    n = jnp.tanh(gi[:, 2 * H:] + r * gh[:, 2 * H:])
    h_new = (1.0 - z) * n + z * h
    out = jnp.dot(h_new, p["w_dec"], precision=hp) + p["b_dec"]
    return out, h_new.reshape(N_LAYERS, 1, HIDDEN)


def init_hidden():
    return jnp.zeros((N_LAYERS, 1, HIDDEN), jnp.float32)


if __name__ == "__main__":
    key = jax.random.PRNGKey(0)
    pkey, tkey, tkey2 = jax.random.split(key, 3)

    params = init_params(pkey)
    w_slab = pack_weights(params)
    emb_slab = pack_embedding(params["emb"])
    hidden = init_hidden()

    # bf16 weights/activations on the MXU vs. the f32 HIGHEST-precision
    # reference leave a few-1e-3 absolute gap on O(1) values; 3e-2 is a wide margin.
    TOL = 3e-2

    # --- Single step: exact GRUmodel.forward(input, hidden) semantics. ---
    tokens = jax.random.randint(tkey, (1, 2), 0, VOCAB, dtype=jnp.int32)
    out1, hid1 = gru_forward(w_slab, emb_slab, tokens, hidden)
    jax.block_until_ready((out1, hid1))
    assert out1.shape == (1, OUTPUT)
    assert hid1.shape == (N_LAYERS, 1, HIDDEN)

    ref_out1, ref_hid1 = gru_reference(params, tokens, hidden)
    assert float(jnp.max(jnp.abs(out1 - ref_out1))) < TOL
    assert float(jnp.max(jnp.abs(hid1 - ref_hid1))) < TOL

    # --- Multi-step decode: T recurrent steps fused into ONE kernel call
    #     (weights/embeddings DMAed once, hidden carried in VMEM scratch). ---
    T = 4
    tokens_T = jax.random.randint(tkey2, (T, 2), 0, VOCAB, dtype=jnp.int32)
    outs, hidT = gru_forward(w_slab, emb_slab, tokens_T, hidden)
    jax.block_until_ready((outs, hidT))
    assert outs.shape == (T, OUTPUT)

    h_ref = hidden
    for s in range(T):
        ref_o, h_ref = gru_reference(params, tokens_T[s], h_ref)
        assert float(jnp.max(jnp.abs(outs[s:s + 1] - ref_o))) < TOL
    assert float(jnp.max(jnp.abs(hidT - h_ref))) < TOL

    print("KERNEL_OK")
</pallas_src>

<mosaic_0001>
module attributes {stable_mosaic.version = 11 : i64} {
  func.func @gru_kernel(%arg0: i32, %arg1: memref<1x2xi32, #tpu.memory_space<smem>>, %arg2: memref<32x1x128xf32, #tpu.memory_space<vmem>>, %arg3: memref<128x640xbf16, #tpu.memory_space<vmem>>, %arg4: memref<1x1x32xf32, #tpu.memory_space<vmem>>, %arg5: memref<1x1x16xf32, #tpu.memory_space<vmem>>, %arg6: memref<1x1x32xf32, #tpu.memory_space<vmem>>, %arg7: memref<1x128xf32, #tpu.memory_space<vmem>>) attributes {dimension_semantics = [#tpu.dimension_semantics<arbitrary>], iteration_bounds = array<i64: 1>, scalar_prefetch = 1 : i64, scratch_operands = 1 : i64, tpu.core_type = #tpu.core_type<tc>, window_params = [{pipeline_mode = #tpu.pipeline_mode<synchronous>, transform_indices = @transform_0, window_bounds = array<i64: 32, 1, 128>}, {pipeline_mode = #tpu.pipeline_mode<synchronous>, transform_indices = @transform_1, window_bounds = array<i64: 128, 640>}, {pipeline_mode = #tpu.pipeline_mode<synchronous>, transform_indices = @transform_2, window_bounds = array<i64: 1, 1, 32>}, {transform_indices = @transform_3, window_bounds = array<i64: 1, 1, 16>}, {pipeline_mode = #tpu.pipeline_mode<synchronous>, transform_indices = @transform_4, window_bounds = array<i64: 1, 1, 32>}]} {
    %c0_i32 = arith.constant 0 : i32
    %0 = arith.cmpi eq, %arg0, %c0_i32 : i32
    %1 = arith.extui %0 : i1 to i32
    %c0_i32_0 = arith.constant 0 : i32
    %2 = arith.cmpi ne, %1, %c0_i32_0 : i32
    scf.if %2 {
      %cst_22 = arith.constant 0.000000e+00 : f32
      %60 = vector.broadcast %cst_22 : f32 to vector<1x128xf32>
      %c0_23 = arith.constant 0 : index
      %c0_24 = arith.constant 0 : index
      %61 = vector.load %arg7[%c0_23, %c0_24] : memref<1x128xf32, #tpu.memory_space<vmem>>, vector<1x128xf32>
      tpu.vector_store %arg7[%c0_23, %c0_24], %60 {strides = array<i32>} : memref<1x128xf32, #tpu.memory_space<vmem>>, vector<1x128xf32>,
      %c0_25 = arith.constant 0 : index
      %c0_26 = arith.constant 0 : index
      %c0_27 = arith.constant 0 : index
      %62 = vector.load %arg4[%c0_25, %c0_26, %c0_27] : memref<1x1x32xf32, #tpu.memory_space<vmem>>, vector<1x1x32xf32>
      %63 = vector.shape_cast %62 : vector<1x1x32xf32> to vector<1x32xf32>
      %c0_28 = arith.constant 0 : index
      %c0_29 = arith.constant 0 : index
      %64 = vector.load %arg7[%c0_28, %c0_29] : memref<1x128xf32, #tpu.memory_space<vmem>>, vector<1x32xf32>
      tpu.vector_store %arg7[%c0_28, %c0_29], %63 {strides = array<i32>} : memref<1x128xf32, #tpu.memory_space<vmem>>, vector<1x32xf32>,
    } else {
    }
    %3 = arith.index_cast %arg0 : i32 to index
    %c0 = arith.constant 0 : index
    %4 = memref.load %arg1[%3, %c0] : memref<1x2xi32, #tpu.memory_space<smem>>
    %5 = arith.index_cast %arg0 : i32 to index
    %c1 = arith.constant 1 : index
    %6 = memref.load %arg1[%5, %c1] : memref<1x2xi32, #tpu.memory_space<smem>>
    %7 = arith.index_cast %4 : i32 to index
    %c0_1 = arith.constant 0 : index
    %c0_2 = arith.constant 0 : index
    %8 = vector.load %arg2[%7, %c0_1, %c0_2] : memref<32x1x128xf32, #tpu.memory_space<vmem>>, vector<1x1x128xf32>
    %9 = vector.shape_cast %8 : vector<1x1x128xf32> to vector<1x128xf32>
    %c16_i32 = arith.constant 16 : i32
    %10 = arith.addi %c16_i32, %6 : i32
    %11 = arith.index_cast %10 : i32 to index
    %c0_3 = arith.constant 0 : index
    %c0_4 = arith.constant 0 : index
    %12 = vector.load %arg2[%11, %c0_3, %c0_4] : memref<32x1x128xf32, #tpu.memory_space<vmem>>, vector<1x1x128xf32>
    %13 = vector.shape_cast %12 : vector<1x1x128xf32> to vector<1x128xf32>
    %c0_5 = arith.constant 0 : index
    %c0_6 = arith.constant 0 : index
    %14 = vector.load %arg7[%c0_5, %c0_6] : memref<1x128xf32, #tpu.memory_space<vmem>>, vector<1x128xf32>
    %15 = arith.addf %14, %9 : vector<1x128xf32>
    %16 = arith.addf %15, %13 : vector<1x128xf32>
    %17 = arith.truncf %16 : vector<1x128xf32> to vector<1x128xbf16>
    %c0_7 = arith.constant 0 : index
    %c0_8 = arith.constant 0 : index
    %18 = vector.load %arg3[%c0_7, %c0_8] : memref<128x640xbf16, #tpu.memory_space<vmem>>, vector<128x512xbf16>
    %cst = arith.constant dense<0.000000e+00> : vector<1x512xf32>
    %19 = tpu.matmul %17, %18, %cst {dimension_numbers = #tpu.dot_dimension_numbers<[1], [0], [0], [1], [0, 0, 1, 1], [], []>} : vector<1x128xbf16>, vector<128x512xbf16>, vector<1x512xf32> -> vector<1x512xf32>
    %20 = vector.extract_strided_slice %19 {offsets = [0, 0], sizes = [1, 128], strides = [1, 1]} : vector<1x512xf32> to vector<1x128xf32>
    %21 = arith.negf %20 : vector<1x128xf32>
    %22 = math.exp %21 : vector<1x128xf32>
    %cst_9 = arith.constant 1.000000e+00 : f32
    %23 = vector.broadcast %cst_9 : f32 to vector<1x128xf32>
    %24 = arith.addf %23, %22 : vector<1x128xf32>
    %25 = arith.divf %23, %24 : vector<1x128xf32>
    %26 = vector.extract_strided_slice %19 {offsets = [0, 128], sizes = [1, 128], strides = [1, 1]} : vector<1x512xf32> to vector<1x128xf32>
    %27 = arith.negf %26 : vector<1x128xf32>
    %28 = math.exp %27 : vector<1x128xf32>
    %cst_10 = arith.constant 1.000000e+00 : f32
    %29 = vector.broadcast %cst_10 : f32 to vector<1x128xf32>
    %30 = arith.addf %29, %28 : vector<1x128xf32>
    %31 = arith.divf %29, %30 : vector<1x128xf32>
    %32 = vector.extract_strided_slice %19 {offsets = [0, 256], sizes = [1, 128], strides = [1, 1]} : vector<1x512xf32> to vector<1x128xf32>
    %33 = vector.extract_strided_slice %19 {offsets = [0, 384], sizes = [1, 128], strides = [1, 1]} : vector<1x512xf32> to vector<1x128xf32>
    %34 = arith.mulf %25, %33 : vector<1x128xf32>
    %35 = arith.addf %32, %34 : vector<1x128xf32>
    %36 = math.tanh %35 : vector<1x128xf32>
    %cst_11 = arith.constant 1.000000e+00 : f32
    %37 = vector.broadcast %cst_11 : f32 to vector<1x128xf32>
    %38 = arith.subf %37, %31 : vector<1x128xf32>
    %39 = arith.mulf %38, %36 : vector<1x128xf32>
    %40 = arith.mulf %31, %14 : vector<1x128xf32>
    %41 = arith.addf %39, %40 : vector<1x128xf32>
    %c0_12 = arith.constant 0 : index
    %c0_13 = arith.constant 0 : index
    %42 = vector.load %arg7[%c0_12, %c0_13] : memref<1x128xf32, #tpu.memory_space<vmem>>, vector<1x128xf32>
    tpu.vector_store %arg7[%c0_12, %c0_13], %41 {strides = array<i32>} : memref<1x128xf32, #tpu.memory_space<vmem>>, vector<1x128xf32>,
    %43 = tpu.iota {dimensions = array<i32: 1>} : vector<1x128xi32>
    %c96_i32 = arith.constant 96 : i32
    %44 = vector.broadcast %c96_i32 : i32 to vector<1x128xi32>
    %45 = arith.cmpi eq, %43, %44 : vector<1x128xi32>
    %46 = arith.extui %45 : vector<1x128xi1> to vector<1x128xi32>
    %47 = arith.sitofp %46 : vector<1x128xi32> to vector<1x128xf32>
    %48 = arith.addf %41, %47 : vector<1x128xf32>
    %49 = arith.truncf %48 : vector<1x128xf32> to vector<1x128xbf16>
    %c0_14 = arith.constant 0 : index
    %c512 = arith.constant 512 : index
    %50 = vector.load %arg3[%c0_14, %c512] : memref<128x640xbf16, #tpu.memory_space<vmem>>, vector<128x128xbf16>
    %cst_15 = arith.constant dense<0.000000e+00> : vector<1x128xf32>
    %51 = tpu.matmul %49, %50, %cst_15 {dimension_numbers = #tpu.dot_dimension_numbers<[1], [0], [0], [1], [0, 0, 1, 1], [], []>} : vector<1x128xbf16>, vector<128x128xbf16>, vector<1x128xf32> -> vector<1x128xf32>
    %52 = vector.extract_strided_slice %51 {offsets = [0, 0], sizes = [1, 16], strides = [1, 1]} : vector<1x128xf32> to vector<1x16xf32>
    %c0_16 = arith.constant 0 : index
    %c0_17 = arith.constant 0 : index
    %c0_18 = arith.constant 0 : index
    %53 = vector.load %arg5[%c0_16, %c0_17, %c0_18] : memref<1x1x16xf32, #tpu.memory_space<vmem>>, vector<1x1x16xf32>
    %54 = vector.shape_cast %53 : vector<1x1x16xf32> to vector<1x16xf32>
    %55 = vector.shape_cast %52 : vector<1x16xf32> to vector<1x1x16xf32>
    tpu.vector_store %arg5[%c0_16, %c0_17, %c0_18], %55 {strides = array<i32>} : memref<1x1x16xf32, #tpu.memory_space<vmem>>, vector<1x1x16xf32>,
    %56 = vector.extract_strided_slice %41 {offsets = [0, 0], sizes = [1, 32], strides = [1, 1]} : vector<1x128xf32> to vector<1x32xf32>
    %c0_19 = arith.constant 0 : index
    %c0_20 = arith.constant 0 : index
    %c0_21 = arith.constant 0 : index
    %57 = vector.load %arg6[%c0_19, %c0_20, %c0_21] : memref<1x1x32xf32, #tpu.memory_space<vmem>>, vector<1x1x32xf32>
    %58 = vector.shape_cast %57 : vector<1x1x32xf32> to vector<1x32xf32>
    %59 = vector.shape_cast %56 : vector<1x32xf32> to vector<1x1x32xf32>
    tpu.vector_store %arg6[%c0_19, %c0_20, %c0_21], %59 {strides = array<i32>} : memref<1x1x32xf32, #tpu.memory_space<vmem>>, vector<1x1x32xf32>,
    return
  }
  func.func @transform_0(%arg0: i32, %arg1: memref<1x2xi32, #tpu.memory_space<smem>>) -> (i32, i32, i32) {
    %c0_i32 = arith.constant 0 : i32
    %c0_i32_0 = arith.constant 0 : i32
    %c0_i32_1 = arith.constant 0 : i32
    %c0_i32_2 = arith.constant 0 : i32
    return %c0_i32, %c0_i32_0, %c0_i32_1 : i32, i32, i32
  }
  func.func @transform_1(%arg0: i32, %arg1: memref<1x2xi32, #tpu.memory_space<smem>>) -> (i32, i32) {
    %c0_i32 = arith.constant 0 : i32
    %c0_i32_0 = arith.constant 0 : i32
    %c0_i32_1 = arith.constant 0 : i32
    return %c0_i32, %c0_i32_0 : i32, i32
  }
  func.func @transform_2(%arg0: i32, %arg1: memref<1x2xi32, #tpu.memory_space<smem>>) -> (i32, i32, i32) {
    %c0_i32 = arith.constant 0 : i32
    %c0_i32_0 = arith.constant 0 : i32
    %c0_i32_1 = arith.constant 0 : i32
    %c0_i32_2 = arith.constant 0 : i32
    return %c0_i32, %c0_i32_0, %c0_i32_1 : i32, i32, i32
  }
  func.func @transform_3(%arg0: i32, %arg1: memref<1x2xi32, #tpu.memory_space<smem>>) -> (i32, i32, i32) {
    %c0_i32 = arith.constant 0 : i32
    %c0_i32_0 = arith.constant 0 : i32
    %c0_i32_1 = arith.constant 0 : i32
    return %arg0, %c0_i32, %c0_i32_0 : i32, i32, i32
  }
  func.func @transform_4(%arg0: i32, %arg1: memref<1x2xi32, #tpu.memory_space<smem>>) -> (i32, i32, i32) {
    %c0_i32 = arith.constant 0 : i32
    %c0_i32_0 = arith.constant 0 : i32
    %c0_i32_1 = arith.constant 0 : i32
    %c0_i32_2 = arith.constant 0 : i32
    return %c0_i32, %c0_i32_0, %c0_i32_1 : i32, i32, i32
  }
}

</mosaic_0001>

<bundles_post_ra>
// kernel: gru_forward.1
= control target key start
LH: loop header
LB: loop body
LE: loop exit
PB: predicated region body
PF: predicated region fallthrough
CT: control target
= control target key end

     0   :  { %s898_s0 = inlined_call_operand.vmem [shape: s32[1,2], index: 0, kind: input, shape index: {}]   ;;  %s899_s1 = inlined_call_operand.hbm [shape: f32[32,1,128], index: 1, kind: input, shape index: {}]   ;;  %s900_s2 = inlined_call_operand.hbm [shape: bf16[128,640], index: 2, kind: input, shape index: {}]   ;;  %s901_s3 = inlined_call_operand.vmem [shape: f32[1,1,32], index: 3, kind: input, shape index: {}]   ;;  %s902_s4 = inlined_call_operand.hbm [shape: f32[1,1,16], index: 4, kind: output, shape index: {0}]   ;;  %s903_s5 = inlined_call_operand.hbm [shape: f32[1,1,32], index: 5, kind: output, shape index: {1}]  }
   0x1   :  { %s11_s20 = sshll.u32 %s898_s0, 4  ;;  %s12_s20 = int_to_ptr.vmem [resolvable:$true] %s11_s20 }
   0x2   :  { %s669_s21 = scalar_lea.vmem %s12_s20, 16  ;;  %p674_p1 = scmp.lt.s32.totalorder %s12_s20, %s12_s20 }
   0x3   :  { %p670_p0 = scmp.ne.s32.totalorder %s12_s20, %s669_s21  ;;  %p675_p2 = scmp.lt.s32.totalorder %s669_s21, %s669_s21 }
   0x5   :  { %p676_p3 = por %p675_p2, %p674_p1 }
   0x7   :  { %p677_p4 = pnand %p676_p3, %p670_p0 }
   0x9   :  { %680 = shalt.err (!%p677_p4)  }
   0xa   :  { %s779_s22 = smov [#allocation4]  }
   0xb   :  { %14 = dma.vmem_to_smem %s12_s20, 16, %s779_s22, [#allocation3] }
   0xc   :  { %769 = dma.done.wait [#allocation3], 16 }
   0xd   :  { %770 = vsyncadd [#allocation3], 4294967280 }
   0xe   :  { %16 = sfence }
   0xf   :  { %17 = vsyncpa [#allocation6], 0 }
  0x10   :  { %18 = vsyncpa [#allocation9], 0 }
  0x11   :  { %19 = vsyncpa [#allocation7], 0 }
  0x12   :  { %20 = vsyncpa [#allocation12], 0  ;;  %s780_s23 = smov [#allocation5]   ;;  %s681_s26 = scalar_lea.hbm %s899_s1, 512 }
  0x13   :  { %s26_s24 = sshll.u32 %s780_s23, 4  ;;  %p682_p5 = scmp.ne.s32.totalorder %s899_s1, %s681_s26  ;;  %s27_s24 = int_to_ptr.vmem [resolvable:$true] %s26_s24 }
  0x14   :  { %p685_p6 = scmp.lt.u32.totalorder %s681_s26, %s899_s1 }
  0x16   :  { %p687_p7 = pnand %p685_p6, %p682_p5 }
  0x18   :  { %690 = shalt.err (!%p687_p7)
}
  0x19   :  { %s691_s6 = scalar_lea.vmem %s27_s24, 512  ;;  %p696_p9 = scmp.lt.s32.totalorder %s27_s24, %s27_s24 }
  0x1a   :  { %p692_p8 = scmp.ne.s32.totalorder %s27_s24, %s691_s6  ;;  %p697_p10 = scmp.lt.s32.totalorder %s691_s6, %s691_s6 }
  0x1c   :  { %p698_p11 = por %p697_p10, %p696_p9 }
  0x1e   :  { %p699_p12 = pnand %p698_p11, %p692_p8 }
  0x20   :  { %702 = shalt.err (!%p699_p12)
}
  0x21   :  { %s781_s7 = smov 16   ;;  %s782_s8 = smov 1  }
  0x22   :  { %32 = dma.hbm_to_vmem [thread:$0]  %s899_s1, 512, %s27_s24, [#allocation6], %s781_s7, %s781_s7, %s782_s8  }
  0x23   :  { %s783_s11 = smov [#allocation8]   ;;  %s703_s15 = scalar_lea.hbm %s900_s2, 5120 }
  0x24   :  { %s38_s12 = sshll.u32 %s783_s11, 4  ;;  %p704_p13 = scmp.ne.s32.totalorder %s900_s2, %s703_s15  ;;  %s39_s12 = int_to_ptr.vmem [resolvable:$true] %s38_s12 }
  0x25   :  { %p707_p0 = scmp.lt.u32.totalorder %s703_s15, %s900_s2 }
  0x27   :  { %p709_p1 = pnand %p707_p0, %p704_p13 }
  0x29   :  { %712 = shalt.err (!%p709_p1)
}
  0x2a   :  { %s713_s20 = scalar_lea.vmem %s39_s12, 5120  ;;  %p718_p3 = scmp.lt.s32.totalorder %s39_s12, %s39_s12 }
  0x2b   :  { %p714_p2 = scmp.ne.s32.totalorder %s39_s12, %s713_s20  ;;  %p719_p4 = scmp.lt.s32.totalorder %s713_s20, %s713_s20 }
  0x2d   :  { %p720_p5 = por %p719_p4, %p718_p3 }
  0x2f   :  { %p721_p6 = pnand %p720_p5, %p714_p2 }
  0x31   :  { %724 = shalt.err (!%p721_p6)
}
  0x32   :  { %s784_s1 = smov 320   ;;  %s785_s21 = smov 20  }
  0x33   :  { %44 = dma.hbm_to_vmem [thread:$0]  %s900_s2, 5120, %s39_s12, [#allocation9], %s784_s1, %s784_s1, %s785_s21  }
  0x34   :  { %771 = dma.done.wait [#allocation6], 512  }
  0x35   :  { %772 = vsyncadd [#allocation6], 4294966784 }
  0x36   :  { %773 = dma.done.wait [#allocation9], 5120  }
  0x37   :  { %774 = vsyncadd [#allocation9], 4294962176  ;;  %v786_v0 = vmov 0   ;;  %v787_v1 = vmov 0.0   ;;  %v603_v2 = vld [vmem:[#allocation8 + $0x4] ss:$20 sps:$4 sm:$0xff]  }
  0x38   :  { %299 = vmatprep.mubr.bf16.mxu0 %v786_v0  ;;  %58 = vst [vmem:[#allocation2] sm:$0x1] %v787_v1  ;;  %340 = vmatprep.mubr.bf16.mxu1 %v786_v0  ;;  %v605_v3 = vld [vmem:[#allocation8] ss:$20 sps:$4 sm:$0xff]   ;;  %v608_v5 = vld [vmem:[#allocation8 + $0x28] ss:$20 sps:$4 sm:$0xff]  }
  0x39   :  { %267 = vmatprep.subr.bf16.mxu0 %v603_v2  ;;  %v606_v4 = vld [vmem:[#allocation8 + $0x2c] ss:$20 sps:$4 sm:$0xff]   ;;  %v609_v6 = vld [vmem:[#allocation8 + $0x54] ss:$20 sps:$4 sm:$0xff]   ;;  %v611_v7 = vld [vmem:[#allocation8 + $0x50] ss:$20 sps:$4 sm:$0xff]  }
  0x3a   :  { %268 = vmatpush1.bf16.msra.mxu0 %v605_v3  ;;  %v612_v8 = vld [vmem:[#allocation8 + $0x7c] ss:$20 sps:$4 sm:$0xff]   ;;  %v621_v9 = vld [vmem:[#allocation8 + $0xc] ss:$20 sps:$4 sm:$0xff]   ;;  %s849_s2 = sld [smem:[#allocation4]]  ;;  %s851_s24 = sld [smem:[#allocation4 + $0x1]]  ;;  %v369_v3 = vlaneseq }
  0x3b   :  { %269 = vmatprep.subr.bf16.mxu0 %v606_v4  ;;  %v623_v10 = vld [vmem:[#allocation8 + $0x8] ss:$20 sps:$4 sm:$0xff]   ;;  %v614_v11 = vld [vmem:[#allocation8 + $0x78] ss:$20 sps:$4 sm:$0xff]   ;;  %308 = vmatprep.subr.bf16.mxu1 %v621_v9  ;;  %v629_v13 = vld [vmem:[#allocation8 + $0x30] ss:$20 sps:$4 sm:$0xff]  }
  0x3c   :  { %309 = vmatpush1.bf16.msra.mxu1 %v623_v10  ;;  %v627_v12 = vld [vmem:[#allocation8 + $0x34] ss:$20 sps:$4 sm:$0xff]   ;;  %v615_v14 = vld [vmem:[#allocation8 + $0xa4] ss:$20 sps:$4 sm:$0xff]   ;;  %vm60_vm0 = vcmask 253952   ;;  %vm788_vm1 = vmmov 0  }
  0x3d   :  { %310 = vmatprep.subr.bf16.mxu1 %v627_v12  ;;  %v633_v15 = vld [vmem:[#allocation8 + $0x5c] ss:$20 sps:$4 sm:$0xff]   ;;  %v617_v17 = vld [vmem:[#allocation8 + $0xa0] ss:$20 sps:$4 sm:$0xff]   ;;  %v635_v18 = vld [vmem:[#allocation8 + $0x58] ss:$20 sps:$4 sm:$0xff]  }
  0x3e   :  { %270 = vmatpush1.bf16.msra.mxu0 %v608_v5  ;;  %v59_v16 = vld [vmem:[%s901_s3] sm:$0x1]  ;;  %v618_v19 = vld [vmem:[#allocation8 + $0xcc] ss:$20 sps:$4 sm:$0xff]   ;;  %v636_v20 = vld [vmem:[#allocation8 + $0x84] ss:$20 sps:$4 sm:$0xff]  }
  0x3f   :  { %271 = vmatprep.subr.bf16.mxu0 %v609_v6  ;;  %61 = vst.msk [vmem:[#allocation2] sm:$0x1] %vm60_vm0, %v59_v16  ;;  %v620_v21 = vld [vmem:[#allocation8 + $0xc8] ss:$20 sps:$4 sm:$0xff]   ;;  %v638_v23 = vld [vmem:[#allocation8 + $0x80] ss:$20 sps:$4 sm:$0xff]  }
  0x40   :  { %311 = vmatpush1.bf16.msra.mxu1 %v629_v13  ;;  %v624_v22 = vld [vmem:[#allocation8 + $0xf4] ss:$20 sps:$4 sm:$0xff]   ;;  %s66_s26 = scalar_lea.vmem [#allocation5], %s849_s2  ;;  %v639_v25 = vld [vmem:[#allocation8 + $0xac] ss:$20 sps:$4 sm:$0xff]   ;;  %s515_s3 = scalar_lea.vmem [#allocation5], %s851_s24 }
  0x41   :  { %312 = vmatprep.subr.bf16.mxu1 %v633_v15  ;;  %v67_v24 = vld [vmem:[%s66_s26] sm:$0x1]  ;;  %v626_v26 = vld [vmem:[#allocation8 + $0xf0] ss:$20 sps:$4 sm:$0xff]   ;;  %v518_v27 = vld [vmem:[%s515_s3 + $0x10] sm:$0x1] }
  0x42   :  { %272 = vmatpush1.bf16.msra.mxu0 %v611_v7  ;;  %v641_v28 = vld [vmem:[#allocation8 + $0xa8] ss:$20 sps:$4 sm:$0xff]   ;;  %v632_v33 = vld [vmem:[#allocation8 + $0x118] ss:$20 sps:$4 sm:$0xff]   ;;  %v644_v34 = vld [vmem:[#allocation8 + $0xd0] ss:$20 sps:$4 sm:$0xff]  }
  0x43   :  { %273 = vmatprep.subr.bf16.mxu0 %v612_v8  ;;  %v630_v29 = vld [vmem:[#allocation8 + $0x11c] ss:$20 sps:$4 sm:$0xff]   ;;  %v642_v31 = vld [vmem:[#allocation8 + $0xd4] ss:$20 sps:$4 sm:$0xff]   ;;  %v647_v38 = vld [vmem:[#allocation8 + $0xf8] ss:$20 sps:$4 sm:$0xff]  }
  0x44   :  { %313 = vmatpush1.bf16.msra.mxu1 %v635_v18  ;;  %v645_v36 = vld [vmem:[#allocation8 + $0xfc] ss:$20 sps:$4 sm:$0xff]   ;;  %v648_v39 = vld [vmem:[#allocation8 + $0x124] ss:$20 sps:$4 sm:$0xff]   ;;  %v650_v40 = vld [vmem:[#allocation8 + $0x120] ss:$20 sps:$4 sm:$0xff]  }
  0x45   :  { %314 = vmatprep.subr.bf16.mxu1 %v636_v20  ;;  %v651_v41 = vld [vmem:[#allocation8 + $0x10] ss:$20 sps:$4 sm:$0xff]   ;;  %v652_v42 = vld [vmem:[#allocation8 + $0x38] ss:$20 sps:$4 sm:$0xff]   ;;  %v653_v43 = vld [vmem:[#allocation8 + $0x60] ss:$20 sps:$4 sm:$0xff]  }
  0x46   :  { %274 = vmatpush1.bf16.msra.mxu0 %v614_v11  ;;  %v859_v30 = vld [vmem:[#allocation2] sm:$0x1]  ;;  %v655_v45 = vld [vmem:[#allocation8 + $0xb0] ss:$20 sps:$4 sm:$0xff]   ;;  %v656_v46 = vld [vmem:[#allocation8 + $0xd8] ss:$20 sps:$4 sm:$0xff]  }
  0x47   :  { %275 = vmatprep.subr.bf16.mxu0 %v615_v14  ;;  %v72_v32 = vadd.f32 %v859_v30, %v67_v24  ;;  %v654_v44 = vld [vmem:[#allocation8 + $0x88] ss:$20 sps:$4 sm:$0xff]   ;;  %v657_v47 = vld [vmem:[#allocation8 + $0x100] ss:$20 sps:$4 sm:$0xff]   ;;  %v370_v4 = vand.u32 127, %v369_v3  ;;  %s789_s27 = smov [#allocation11]  }
  0x48   :  { %315 = vmatpush1.bf16.msra.mxu1 %v638_v23  ;;  %v658_v48 = vld [vmem:[#allocation8 + $0x128] ss:$20 sps:$4 sm:$0xff]   ;;  %s500_s28 = sshll.u32 %s789_s27, 4  ;;  %s501_s28 = int_to_ptr.vmem [resolvable:$true] %s500_s28 }
  0x49   :  { %316 = vmatprep.subr.bf16.mxu1 %v639_v25  ;;  %v73_v35 = vadd.f32 %v518_v27, %v72_v32  ;;  %vm371_vm2 = vcmp.eq.s32.totalorder %v370_v4, 96  ;;  %s725_s29 = scalar_lea.vmem %s501_s28, 16  ;;  %s729_s30 = scalar_lea.vmem %s501_s28, 32 }
  0x4a   :  { %276 = vmatpush1.bf16.msra.mxu0 %v617_v17  ;;  %v553_v10 = vsel %vm371_vm2, 1.0, %v787_v1  ;;  %p726_p7 = scmp.ne.s32.totalorder %s501_s28, %s725_s29  ;;  %p730_p8 = scmp.lt.s32.totalorder %s501_s28, %s501_s28 }
  0x4b   :  { %277 = vmatprep.subr.bf16.mxu0 %v618_v19  ;;  %v74_v37 = vpack.c.bf16 %v73_v35, %v73_v35  ;;  %p731_p9 = scmp.lt.s32.totalorder %s729_s30, %s725_s29 }
  0x4c   :  { %317 = vmatpush1.bf16.msra.mxu1 %v641_v28 }
  0x4d   :  { %318 = vmatprep.subr.bf16.mxu1 %v642_v31  ;;  %p732_p10 = por %p731_p9, %p730_p8 }
  0x4e   :  { %278 = vmatpush1.bf16.msra.mxu0 %v620_v21 }
  0x4f   :  { %279 = vmatprep.subr.bf16.mxu0 %v624_v22  ;;  %p733_p11 = pnand %p732_p10, %p726_p7 }
  0x50   :  { %319 = vmatpush1.bf16.msra.mxu1 %v644_v34 }
  0x51   :  { %320 = vmatprep.subr.bf16.mxu1 %v645_v36 }
  0x52   :  { %280 = vmatpush1.bf16.msra.mxu0 %v626_v26 }
  0x53   :  { %281 = vmatprep.subr.bf16.mxu0 %v630_v29 }
  0x54   :  { %321 = vmatpush1.bf16.msra.mxu1 %v647_v38 }
  0x55   :  { %322 = vmatprep.subr.bf16.mxu1 %v648_v39 }
  0x56   :  { %282 = vmatpush1.bf16.msra.mxu0 %v632_v33 }
  0x57   :  { %571 = vmatprep.subr.bf16.mxu0 %v787_v1 }
  0x58   :  { %323 = vmatpush1.bf16.msra.mxu1 %v650_v40 }
  0x59   :  { %300 = vmatmul.mubr.bf16.vlgmr.msra.gmra.mrb[0].mxu0 %v74_v37 }
  0x5a   :  { %572 = vmatpush3.bf16.msra.mxu0 %v651_v41  ;;  %587 = vmatprep.mubr.msk.bf16.mxu0 %vm788_vm1, %v787_v1 }
  0x5b   :  { %341 = vmatmul.mubr.bf16.vlgmr.msra.gmra.mrb[0].mxu1 %v74_v37  ;;  %573 = vmatprep.subr.bf16.mxu0 %v787_v1 }
  0x5e   :  { %574 = vmatpush3.bf16.msra.mxu0 %v652_v42 }
  0x5f   :  { %575 = vmatprep.subr.bf16.mxu0 %v787_v1 }
  0x62   :  { %576 = vmatpush3.bf16.msra.mxu0 %v653_v43 }
  0x63   :  { %577 = vmatprep.subr.bf16.mxu0 %v787_v1 }
  0x66   :  { %578 = vmatpush3.bf16.msra.mxu0 %v654_v44 }
  0x67   :  { %579 = vmatprep.subr.bf16.mxu0 %v787_v1 }
  0x6a   :  { %580 = vmatpush3.bf16.msra.mxu0 %v655_v45 }
  0x6b   :  { %581 = vmatprep.subr.bf16.mxu0 %v787_v1 }
  0x6e   :  { %582 = vmatpush3.bf16.msra.mxu0 %v656_v46 }
  0x6f   :  { %583 = vmatprep.subr.bf16.mxu0 %v787_v1 }
  0x72   :  { %584 = vmatpush3.bf16.msra.mxu0 %v657_v47 }
  0x73   :  { %585 = vmatprep.subr.bf16.mxu0 %v787_v1 }
  0x76   :  { %586 = vmatpush3.bf16.msra.mxu0 %v658_v48 }
 0x12c   :  { %v301_v49 = vpop.f32.mrb[0].mxu0 }
 0x12d   :  { %v551_v50 = vmul.f32 -1.442695, %v301_v49  ;;  %v303_v51 = vpop.f32.mrb[1].mxu0 }
 0x12e   :  { %v305_v52 = vpop.f32.mrb[2].mxu0  ;;  %v552_v54 = vmul.f32 -1.442695, %v303_v51  ;;  %v342_v55 = vpop.f32.mrb[0].mxu1 }
 0x12f   :  { %659 = vpow2.f32 %v551_v50  ;;  %v306_v53 = vpop.f32.mrb[3].mxu0  ;;  %v344_v56 = vpop.f32.mrb[1].mxu1 }
 0x130   :  { %661 = vpow2.f32 %v552_v54  ;;  %v346_v57 = vpop.f32.mrb[2].mxu1 }
 0x131   :  { %v347_v58 = vpop.f32.mrb[3].mxu1 }
 0x139   :  { %v660_v59 = vpop.eup %659 }
 0x13a   :  { %v352_v60 = vadd.f32 1.0, %v660_v59  ;;  %v662_v61 = vpop.eup %661 }
 0x13b   :  { %v358_v62 = vadd.f32 1.0, %v662_v61 }
 0x13c   :  { %663 = vrcp.f32 %v352_v60 }
 0x13d   :  { %665 = vrcp.f32 %v358_v62 }
 0x146   :  { %v664_v63 = vpop.eup %663 }
 0x147   :  { %v361_v0 = vmul.f32 %v664_v63, %v344_v56  ;;  %v666_v5 = vpop.eup %665 }
 0x148   :  { %v364_v6 = vsub.f32 1.0, %v666_v5  ;;  %v366_v9 = vmul.f32 %v666_v5, %v859_v30 }
 0x149   :  { %v362_v2 = vadd.f32 %v361_v0, %v342_v55 }
 0x14b   :  { %667 = vtanh.f32 %v362_v2 }
 0x155   :  { %v668_v7 = vpop.eup %667 }
 0x156   :  { %v365_v8 = vmul.f32 %v668_v7, %v364_v6 }
 0x158   :  { %v367_v11 = vadd.f32 %v366_v9, %v365_v8 }
 0x15a   :  { %368 = vst [vmem:[#allocation2] sm:$0x1] %v367_v11  ;;  %v374_v12 = vadd.f32 %v553_v10, %v367_v11  ;;  %483 = vst.msk [vmem:[#allocation11] sm:$0x1] %vm60_vm0, %v367_v11 }
 0x15c   :  { %v375_v13 = vpack.c.bf16 %v374_v12, %v374_v12 }
 0x15e   :  { %588 = vmatmul.mubr.bf16.vlgmr.msra.gmra.mrb[4].mxu0 %v375_v13 }
 0x15f   :  { %736 = shalt.err (!%p733_p11)
}
 0x160   :  { %s737_s8 = scalar_lea.hbm %s903_s5, 16 }
 0x161   :  { %p738_p12 = scmp.ne.s32.totalorder %s903_s5, %s737_s8  ;;  %p741_p13 = scmp.lt.u32.totalorder %s737_s8, %s903_s5 }
 0x163   :  { %p743_p0 = pnand %p741_p13, %p738_p12 }
 0x165   :  { %746 = shalt.err (!%p743_p0)
}
 0x166   :  { %503 = dma.vmem_to_hbm [thread:$0]  %s501_s28, 16, %s903_s5, [#allocation12]   ;;  %vm480_vm3 = vcmask 122880  }
 0x167   :  { %s790_s15 = smov [#allocation10]  }
 0x168   :  { %s490_s16 = sshll.u32 %s790_s15, 4  ;;  %s491_s16 = int_to_ptr.vmem [resolvable:$true] %s490_s16 }
 0x169   :  { %s747_s17 = scalar_lea.vmem %s491_s16, 16  ;;  %s751_s18 = scalar_lea.vmem %s491_s16, 32 }
 0x16a   :  { %p748_p1 = scmp.ne.s32.totalorder %s491_s16, %s747_s17  ;;  %p752_p2 = scmp.lt.s32.totalorder %s491_s16, %s491_s16 }
 0x16b   :  { %p753_p3 = scmp.lt.s32.totalorder %s751_s18, %s747_s17 }
 0x16d   :  { %p754_p4 = por %p753_p3, %p752_p2 }
 0x16f   :  { %p755_p5 = pnand %p754_p4, %p748_p1 }
 0x231   :  { %v474_v1 = vpop.f32.mrb[4].mxu0 }
 0x232   :  { %v589_v14 = vpop.f32.mrb[5].mxu0  ;;  %481 = vst.msk [vmem:[#allocation10] sm:$0x1] %vm480_vm3, %v474_v1 }
 0x233   :  { %v477_v15 = vpop.f32.mrb[6].mxu0 }
 0x234   :  { %758 = shalt.err (!%p755_p5)
}
 0x235   :  { %s759_s5 = scalar_lea.hbm %s902_s4, 16 }
 0x236   :  { %p760_p6 = scmp.ne.s32.totalorder %s902_s4, %s759_s5  ;;  %p763_p7 = scmp.lt.u32.totalorder %s759_s5, %s902_s4 }
 0x238   :  { %p765_p8 = pnand %p763_p7, %p760_p6 }
 0x23a   :  { %768 = shalt.err (!%p765_p8)
}
 0x23b   :  { %493 = dma.vmem_to_hbm [thread:$0]  %s491_s16, 16, %s902_s4, [#allocation7]   ;;  %v590_v16 = vpop.f32.mrb[7].mxu0 }
 0x23c   :  { %775 = dma.done.wait [#allocation7], 16  }
 0x23d   :  { %776 = vsyncadd [#allocation7], 4294967280 }
 0x23e   :  { %777 = dma.done.wait [#allocation12], 16  }
 0x23f   :  { %778 = vsyncadd [#allocation12], 4294967280 }
 0x240   :  { %510 = vsyncpa [#allocation6], 1 }
 0x241   :  { %511 = vsyncpa [#allocation9], 1 }
 0x242   :  { %512 = vsyncpa [#allocation7], 1 }
 0x243   :  { %513 = vsyncpa [#allocation12], 1 }

</bundles_post_ra>
